<compile_context>
chip_gen: v5e
topology: v5e:2x2
jax: 0.10.0
libtpu: 0.0.40
codegen_flags: <defaults>
</compile_context>

<pallas_src>
import functools

import jax
import jax.numpy as jnp
from jax.experimental import pallas as pl
from jax.experimental.pallas import tpu as pltpu


def _round_up(x: int, m: int) -> int:
    return (x + m - 1) // m * m


def _fused_dft_matrices(L: int, L_pad: int, F_pad: int):
    """Fused, lane-padded, bf16 real-DFT matrices (each half 128-aligned).

    rfft :  [Xr | Xi] = x @ W       W: (L_pad, 2*F_pad) = [Wr_pad | Wi_pad]
    irfft:  x = [Xr | Xi] @ A       A: (2*F_pad, L_pad) = [Ar_pad ; Ai_pad]
    Padded columns of W / rows of A are zero, so padding is mathematically exact.
    Angles are range-reduced with integer (n*k) mod L before cos/sin so large-L
    matrices do not lose precision in f32.
    """
    F = L // 2 + 1
    n = jnp.arange(L, dtype=jnp.int32)[:, None]          # (L, 1)
    k = jnp.arange(F, dtype=jnp.int32)[None, :]          # (1, F)
    nk = (n * k) % L                                     # exact integer range reduction
    ang = (2.0 * jnp.pi / L) * nk.astype(jnp.float32)    # (L, F)

    Wr = jnp.cos(ang)
    Wi = -jnp.sin(ang)
    Wr = jnp.pad(Wr, ((0, L_pad - L), (0, F_pad - F)))
    Wi = jnp.pad(Wi, ((0, L_pad - L), (0, F_pad - F)))
    W = jnp.concatenate([Wr, Wi], axis=1)                # (L_pad, 2*F_pad)

    kk = jnp.arange(F)
    is_dc = kk == 0
    is_nyq = (kk == L // 2) if (L % 2 == 0) else jnp.zeros_like(is_dc)
    w = jnp.where(is_dc | is_nyq, 1.0, 2.0).astype(jnp.float32) / L    # (F,)
    ang2 = ang.T                                         # (F, L)
    Ar = w[:, None] * jnp.cos(ang2)
    Ai = -w[:, None] * jnp.sin(ang2)
    Ar = jnp.pad(Ar, ((0, F_pad - F), (0, L_pad - L)))
    Ai = jnp.pad(Ai, ((0, F_pad - F), (0, L_pad - L)))
    A = jnp.concatenate([Ar, Ai], axis=0)                # (2*F_pad, L_pad)

    return W.astype(jnp.bfloat16), A.astype(jnp.bfloat16)


def _freqdrop_kernel(x_ref, keep_ref, w_ref, a_ref, o_ref):
    # x_ref   : (TM, L_pad)        bf16 rows (B*C folded)
    # keep_ref: (TM, F_pad)        bf16 keep mask (one copy per frequency bin)
    # w_ref   : (L_pad, 2*F_pad)   bf16 fused rfft matrix  [Wr | Wi]
    # a_ref   : (2*F_pad, L_pad)   bf16 fused irfft matrix [Ar ; Ai]
    # o_ref   : (TM, L_pad)        f32 augmented rows
    xf = jnp.dot(x_ref[...], w_ref[...], preferred_element_type=jnp.float32)   # MXU
    keep2 = jnp.concatenate([keep_ref[...], keep_ref[...]], axis=-1)           # (TM, 2*F_pad)
    xf_b = xf.astype(jnp.bfloat16) * keep2                                     # VPU, exact {0,1}
    o_ref[...] = jnp.dot(xf_b, a_ref[...], preferred_element_type=jnp.float32)  # MXU


def _resident_const_spec(shape):
    """Whole-array constant block; single-buffered where supported."""
    index_map = lambda r: (0, 0)
    try:
        return pl.BlockSpec(shape, index_map, pipeline_mode=pl.Buffered(1))
    except Exception:  # older jax without pipeline_mode / Buffered
        return pl.BlockSpec(shape, index_map)


@functools.partial(jax.jit, static_argnames=("tm_max",))
def freqdropout(x, keep, batch_mask, *, tm_max=256):
    """x: (B,C,L) f32, keep: (B,C,F) in {0,1} (1=keep bin), batch_mask: (B,1,1) in {0,1}."""
    B, C, L = x.shape
    F = L // 2 + 1

    L_pad = _round_up(L, 128)
    F_pad = _round_up(F, 128)
    F2_pad = 2 * F_pad
    R = B * C

    TM = min(tm_max, _round_up(R, 8))
    R_pad = _round_up(R, TM)
    # If the row grid has a single step, split it so the "parallel" axis can be
    # sharded across v7x's two TensorCores (no-op on 1-TC chips).
    if R_pad // TM < 2 and TM >= 32:
        TM = _round_up(TM // 2, 16)
        R_pad = _round_up(R, TM)

    # Frequency keep mask: one bf16 copy per bin (duplicated across re/im in-kernel).
    keep2 = keep.reshape(R, F).astype(jnp.bfloat16)
    if (R_pad, F_pad) != (R, F):
        keep2 = jnp.pad(keep2, ((0, R_pad - R), (0, F_pad - F)))

    # bf16 input rows (the MXU path is bf16 anyway; halves DMA + VMEM).
    x2 = x.reshape(R, L).astype(jnp.bfloat16)
    if (R_pad, L_pad) != (R, L):
        x2 = jnp.pad(x2, ((0, R_pad - R), (0, L_pad - L)))

    W, A = _fused_dft_matrices(L, L_pad, F_pad)

    grid = (R_pad // TM,)
    flops = 2 * 2 * R_pad * L_pad * F2_pad
    bytes_accessed = (x2.size * 2 + keep2.size * 2 + W.size * 2 + A.size * 2
                      + R_pad * L_pad * 4)
    cost = pl.CostEstimate(flops=flops, transcendentals=0,
                           bytes_accessed=bytes_accessed)

    # VMEM estimate: single-buffered constants + double-buffered row tiles +
    # the xf intermediate (f32 result, bf16 copy, bf16 mask concat).
    const_vmem = 2 * 2 * L_pad * F2_pad
    tile_vmem = 2 * TM * (2 * L_pad + 2 * F_pad + 4 * L_pad)
    interm_vmem = TM * F2_pad * (4 + 2 + 2)
    vmem_est = const_vmem + tile_vmem + interm_vmem

    try:
        vmem_cap = int(pltpu.get_tpu_info().vmem_capacity_bytes)
    except Exception:
        vmem_cap = 64 << 20  # conservative: v7x per-TensorCore VMEM
    vmem_limit = int(min(max(int(vmem_est * 1.5), 32 << 20), vmem_cap - (8 << 20)))

    out = pl.pallas_call(
        _freqdrop_kernel,
        out_shape=jax.ShapeDtypeStruct((R_pad, L_pad), jnp.float32),
        grid_spec=pltpu.PrefetchScalarGridSpec(
            num_scalar_prefetch=0,
            grid=grid,
            in_specs=[
                pl.BlockSpec((TM, L_pad), lambda r: (r, 0)),   # x row tile (bf16)
                pl.BlockSpec((TM, F_pad), lambda r: (r, 0)),   # keep mask tile (bf16)
                _resident_const_spec((L_pad, F2_pad)),         # W (constant, single-buffered)
                _resident_const_spec((F2_pad, L_pad)),         # A (constant, single-buffered)
            ],
            out_specs=pl.BlockSpec((TM, L_pad), lambda r: (r, 0)),
        ),
        compiler_params=pltpu.CompilerParams(
            dimension_semantics=("parallel",),
            vmem_limit_bytes=vmem_limit),
        cost_estimate=cost,
    )(x2, keep2, W, A)

    if (R_pad, L_pad) != (R, L):
        out = out[:R, :L]
    x_aug = out.reshape(B, C, L)

    # Time-domain per-sample blend on the original f32 x: exact passthrough for
    # non-augmented samples (matches the torch module bit-for-bit there).
    return x * (1.0 - batch_mask) + x_aug * batch_mask


if __name__ == "__main__":
    rate = 0.2
    p = 0.5
    B, C, L = 2, 4, 16
    F = L // 2 + 1

    key = jax.random.PRNGKey(0)
    kx, kb, km = jax.random.split(key, 3)

    x = jax.random.normal(kx, (B, C, L), dtype=jnp.float32)

    # mask = rand(B,1,1) < p   (choose augmented vs original per sample)
    batch_mask = (jax.random.uniform(kb, (B, 1, 1)) < p).astype(jnp.float32)
    # m = uniform(x_f.shape) < rate  (drop frequency bins); keep = ~m
    drop = jax.random.uniform(km, (B, C, F)) < rate
    keep = (~drop).astype(jnp.float32)

    out = jax.block_until_ready(freqdropout(x, keep, batch_mask))

    # Pure-JAX reference using the same random masks.
    xf = jnp.fft.rfft(x, axis=-1)
    x_aug_ref = jnp.fft.irfft(jnp.real(xf) * keep + 1j * (jnp.imag(xf) * keep),
                              n=L, axis=-1)
    ref = x * (1.0 - batch_mask) + x_aug_ref * batch_mask

    # bf16 MXU path (bf16 DFT matrices / operands, f32 accumulation): roundtrip
    # error ~1e-2 absolute on unit-scale data; non-augmented samples are exact.
    assert jnp.allclose(out, ref, atol=5e-2, rtol=5e-2), "mismatch vs reference"
    print("KERNEL_OK")
</pallas_src>

<mosaic_0001>
module attributes {stable_mosaic.version = 11 : i64} {
  func.func @_freqdrop_kernel(%arg0: i32, %arg1: memref<8x128xbf16, #tpu.memory_space<vmem>>, %arg2: memref<8x128xbf16, #tpu.memory_space<vmem>>, %arg3: memref<128x256xbf16, #tpu.memory_space<vmem>>, %arg4: memref<256x128xbf16, #tpu.memory_space<vmem>>, %arg5: memref<8x128xf32, #tpu.memory_space<vmem>>) attributes {dimension_semantics = [#tpu.dimension_semantics<parallel>], iteration_bounds = array<i64: 1>, scalar_prefetch = 0 : i64, scratch_operands = 0 : i64, tpu.core_type = #tpu.core_type<tc>, window_params = [{transform_indices = @transform_0, window_bounds = array<i64: 8, 128>}, {transform_indices = @transform_1, window_bounds = array<i64: 8, 128>}, {pipeline_mode = #tpu.pipeline_mode<synchronous>, transform_indices = @transform_2, window_bounds = array<i64: 128, 256>}, {pipeline_mode = #tpu.pipeline_mode<synchronous>, transform_indices = @transform_3, window_bounds = array<i64: 256, 128>}, {transform_indices = @transform_4, window_bounds = array<i64: 8, 128>}]} {
    %c0 = arith.constant 0 : index
    %c0_0 = arith.constant 0 : index
    %0 = vector.load %arg1[%c0, %c0_0] : memref<8x128xbf16, #tpu.memory_space<vmem>>, vector<8x128xbf16>
    %c0_1 = arith.constant 0 : index
    %c0_2 = arith.constant 0 : index
    %1 = vector.load %arg3[%c0_1, %c0_2] : memref<128x256xbf16, #tpu.memory_space<vmem>>, vector<128x256xbf16>
    %cst = arith.constant dense<0.000000e+00> : vector<8x256xf32>
    %2 = tpu.matmul %0, %1, %cst {dimension_numbers = #tpu.dot_dimension_numbers<[1], [0], [0], [1], [0, 0, 1, 1], [], []>} : vector<8x128xbf16>, vector<128x256xbf16>, vector<8x256xf32> -> vector<8x256xf32>
    %c0_3 = arith.constant 0 : index
    %c0_4 = arith.constant 0 : index
    %3 = vector.load %arg2[%c0_3, %c0_4] : memref<8x128xbf16, #tpu.memory_space<vmem>>, vector<8x128xbf16>
    %c0_5 = arith.constant 0 : index
    %c0_6 = arith.constant 0 : index
    %4 = vector.load %arg2[%c0_5, %c0_6] : memref<8x128xbf16, #tpu.memory_space<vmem>>, vector<8x128xbf16>
    %5 = tpu.concatenate %3, %4 in 1 : vector<8x128xbf16>, vector<8x128xbf16> -> vector<8x256xbf16>
    %6 = arith.truncf %2 : vector<8x256xf32> to vector<8x256xbf16>
    %7 = arith.mulf %6, %5 : vector<8x256xbf16>
    %c0_7 = arith.constant 0 : index
    %c0_8 = arith.constant 0 : index
    %8 = vector.load %arg4[%c0_7, %c0_8] : memref<256x128xbf16, #tpu.memory_space<vmem>>, vector<256x128xbf16>
    %cst_9 = arith.constant dense<0.000000e+00> : vector<8x128xf32>
    %9 = tpu.matmul %7, %8, %cst_9 {dimension_numbers = #tpu.dot_dimension_numbers<[1], [0], [0], [1], [0, 0, 1, 1], [], []>} : vector<8x256xbf16>, vector<256x128xbf16>, vector<8x128xf32> -> vector<8x128xf32>
    %c0_10 = arith.constant 0 : index
    %c0_11 = arith.constant 0 : index
    %10 = vector.load %arg5[%c0_10, %c0_11] : memref<8x128xf32, #tpu.memory_space<vmem>>, vector<8x128xf32>
    tpu.vector_store %arg5[%c0_10, %c0_11], %9 {strides = array<i32>} : memref<8x128xf32, #tpu.memory_space<vmem>>, vector<8x128xf32>,
    return
  }
  func.func @transform_0(%arg0: i32) -> (i32, i32) {
    %c0_i32 = arith.constant 0 : i32
    %c0_i32_0 = arith.constant 0 : i32
    return %arg0, %c0_i32 : i32, i32
  }
  func.func @transform_1(%arg0: i32) -> (i32, i32) {
    %c0_i32 = arith.constant 0 : i32
    %c0_i32_0 = arith.constant 0 : i32
    return %arg0, %c0_i32 : i32, i32
  }
  func.func @transform_2(%arg0: i32) -> (i32, i32) {
    %c0_i32 = arith.constant 0 : i32
    %c0_i32_0 = arith.constant 0 : i32
    %c0_i32_1 = arith.constant 0 : i32
    return %c0_i32, %c0_i32_0 : i32, i32
  }
  func.func @transform_3(%arg0: i32) -> (i32, i32) {
    %c0_i32 = arith.constant 0 : i32
    %c0_i32_0 = arith.constant 0 : i32
    %c0_i32_1 = arith.constant 0 : i32
    return %c0_i32, %c0_i32_0 : i32, i32
  }
  func.func @transform_4(%arg0: i32) -> (i32, i32) {
    %c0_i32 = arith.constant 0 : i32
    %c0_i32_0 = arith.constant 0 : i32
    return %arg0, %c0_i32 : i32, i32
  }
}

</mosaic_0001>

<bundles_post_ra>
// kernel: freqdropout.1
= control target key start
LH: loop header
LB: loop body
LE: loop exit
PB: predicated region body
PF: predicated region fallthrough
CT: control target
= control target key end

     0   :  { %s646_s2 = inlined_call_operand.vmem [shape: bf16[128,256], index: 2, kind: input, shape index: {}]   ;;  %s647_s3 = inlined_call_operand.vmem [shape: bf16[256,128], index: 3, kind: input, shape index: {}]   ;;  %s648_s0 = inlined_call_operand.vmem [shape: bf16[8,128], index: 0, kind: input, shape index: {}]   ;;  %s649_s1 = inlined_call_operand.vmem [shape: bf16[8,128], index: 1, kind: input, shape index: {}]   ;;  %s650_s4 = inlined_call_operand.vmem [shape: f32[8,128], index: 4, kind: output, shape index: {}]  }
   0x1   :  { %v366_v0 = vld [vmem:[%s646_s2 + $0x70] sm:$0xf]  ;;  %v451_v1 = vld [vmem:[%s646_s2 + $0x74] sm:$0xf0]  ;;  %v450_v2 = vld [vmem:[%s646_s2 + $0x74] sm:$0xf] }
   0x2   :  { %v367_v3 = vor.u32 %v451_v1, %v366_v0  ;;  %v368_v4 = vld [vmem:[%s646_s2 + $0x78] sm:$0xf0]  ;;  %v358_v5 = vld [vmem:[%s646_s2 + $0x60] sm:$0xf]  ;;  %v449_v6 = vld [vmem:[%s646_s2 + $0x64] sm:$0xf0] }
   0x3   :  { %v371_v7 = vor.u32 %v450_v2, %v368_v4  ;;  %v448_v8 = vld [vmem:[%s646_s2 + $0x64] sm:$0xf]  ;;  %v360_v9 = vld [vmem:[%s646_s2 + $0x68] sm:$0xf0]  ;;  %v359_v10 = vor.u32 %v449_v6, %v358_v5  ;;  %v350_v12 = vld [vmem:[%s646_s2 + $0x50] sm:$0xf] }
   0x4   :  { %114 = vmatpush.bf16.msra.mxu0 %v367_v3  ;;  %v363_v11 = vor.u32 %v448_v8, %v360_v9  ;;  %v447_v13 = vld [vmem:[%s646_s2 + $0x54] sm:$0xf0]  ;;  %v446_v14 = vld [vmem:[%s646_s2 + $0x54] sm:$0xf]  ;;  %v352_v15 = vld [vmem:[%s646_s2 + $0x58] sm:$0xf0] }
   0x5   :  { %127 = vmatpush.bf16.msra.mxu1 %v371_v7  ;;  %v351_v16 = vor.u32 %v447_v13, %v350_v12  ;;  %v355_v17 = vor.u32 %v446_v14, %v352_v15  ;;  %v342_v18 = vld [vmem:[%s646_s2 + $0x40] sm:$0xf]  ;;  %v445_v19 = vld [vmem:[%s646_s2 + $0x44] sm:$0xf0]  ;;  %v444_v20 = vld [vmem:[%s646_s2 + $0x44] sm:$0xf] }
   0x6   :  { %v344_v21 = vld [vmem:[%s646_s2 + $0x48] sm:$0xf0]  ;;  %v343_v22 = vor.u32 %v445_v19, %v342_v18  ;;  %v459_v23 = vld [vmem:[%s647_s3 + $0x38] sm:$0xff]  ;;  %v334_v26 = vld [vmem:[%s646_s2 + $0x30] sm:$0xf] }
   0x7   :  { %v467_v24 = vld [vmem:[%s647_s3 + $0x78] sm:$0xff]  ;;  %v347_v25 = vor.u32 %v444_v20, %v344_v21  ;;  %v442_v28 = vld [vmem:[%s646_s2 + $0x34] sm:$0xf]  ;;  %277 = vmatpush.bf16.msra.mxu2 %v459_v23  ;;  %v326_v34 = vld [vmem:[%s646_s2 + $0x20] sm:$0xf] }
   0x8   :  { %115 = vmatpush.bf16.msra.mxu0 %v359_v10  ;;  %v443_v27 = vld [vmem:[%s646_s2 + $0x34] sm:$0xf0]  ;;  %v336_v29 = vld [vmem:[%s646_s2 + $0x38] sm:$0xf0]  ;;  %290 = vmatpush.bf16.msra.mxu3 %v467_v24  ;;  %v458_v30 = vld [vmem:[%s647_s3 + $0x30] sm:$0xff] }
   0x9   :  { %128 = vmatpush.bf16.msra.mxu1 %v363_v11  ;;  %v466_v31 = vld [vmem:[%s647_s3 + $0x70] sm:$0xff]  ;;  %v335_v32 = vor.u32 %v443_v27, %v334_v26  ;;  %v339_v33 = vor.u32 %v442_v28, %v336_v29  ;;  %v441_v35 = vld [vmem:[%s646_s2 + $0x24] sm:$0xf0]  ;;  %v440_v36 = vld [vmem:[%s646_s2 + $0x24] sm:$0xf] }
   0xa   :  { %v328_v37 = vld [vmem:[%s646_s2 + $0x28] sm:$0xf0]  ;;  %v327_v40 = vor.u32 %v441_v35, %v326_v34  ;;  %v318_v42 = vld [vmem:[%s646_s2 + $0x10] sm:$0xf]  ;;  %v439_v43 = vld [vmem:[%s646_s2 + $0x14] sm:$0xf0] }
   0xb   :  { %278 = vmatpush.bf16.msra.mxu2 %v458_v30  ;;  %v457_v38 = vld [vmem:[%s647_s3 + $0x28] sm:$0xff]  ;;  %v331_v41 = vor.u32 %v440_v36, %v328_v37  ;;  %v438_v44 = vld [vmem:[%s646_s2 + $0x14] sm:$0xf]  ;;  %v320_v45 = vld [vmem:[%s646_s2 + $0x18] sm:$0xf0]  ;;  %v319_v48 = vor.u32 %v439_v43, %v318_v42 }
   0xc   :  { %116 = vmatpush.bf16.msra.mxu0 %v351_v16  ;;  %291 = vmatpush.bf16.msra.mxu3 %v466_v31  ;;  %v465_v39 = vld [vmem:[%s647_s3 + $0x68] sm:$0xff]  ;;  %v456_v46 = vld [vmem:[%s647_s3 + $0x20] sm:$0xff]  ;;  %v323_v49 = vor.u32 %v438_v44, %v320_v45  ;;  %v455_v54 = vld [vmem:[%s647_s3 + $0x18] sm:$0xff] }
   0xd   :  { %129 = vmatpush.bf16.msra.mxu1 %v355_v17  ;;  %v464_v47 = vld [vmem:[%s647_s3 + $0x60] sm:$0xff]  ;;  %v437_v51 = vld [vmem:[%s646_s2 + $0x4] sm:$0xf0]  ;;  %v312_v53 = vld [vmem:[%s646_s2 + $0x8] sm:$0xf0] }
   0xe   :  { %v310_v50 = vld [vmem:[%s646_s2] sm:$0xf]  ;;  %v436_v52 = vld [vmem:[%s646_s2 + $0x4] sm:$0xf]  ;;  %v463_v55 = vld [vmem:[%s647_s3 + $0x58] sm:$0xff] }
   0xf   :  { %279 = vmatpush.bf16.msra.mxu2 %v457_v38  ;;  %v311_v56 = vor.u32 %v437_v51, %v310_v50  ;;  %v315_v57 = vor.u32 %v436_v52, %v312_v53  ;;  %v454_v58 = vld [vmem:[%s647_s3 + $0x10] sm:$0xff]  ;;  %v17_v60 = vld [vmem:[%s648_s0] sm:$0xf]  ;;  %v453_v61 = vld [vmem:[%s647_s3 + $0x8] sm:$0xff] }
  0x10   :  { %117 = vmatpush.bf16.msra.mxu0 %v343_v22  ;;  %292 = vmatpush.bf16.msra.mxu3 %v465_v39  ;;  %v462_v59 = vld [vmem:[%s647_s3 + $0x50] sm:$0xff]  ;;  %v461_v62 = vld [vmem:[%s647_s3 + $0x48] sm:$0xff]  ;;  %v452_v63 = vld [vmem:[%s647_s3] sm:$0xff] }
  0x11   :  { %130 = vmatpush.bf16.msra.mxu1 %v347_v25  ;;  %v460_v0 = vld [vmem:[%s647_s3 + $0x40] sm:$0xff] }
  0x12   :  { %v140_v1 = vld [vmem:[%s649_s1] sm:$0xf] }
  0x13   :  { %280 = vmatpush.bf16.msra.mxu2 %v456_v46  ;;  %v144_v5 = vunpack.c.l.bf16 %v140_v1 }
  0x14   :  { %118 = vmatpush.bf16.msra.mxu0 %v335_v32  ;;  %293 = vmatpush.bf16.msra.mxu3 %v464_v47 }
  0x15   :  { %131 = vmatpush.bf16.msra.mxu1 %v339_v33 }
  0x17   :  { %281 = vmatpush.bf16.msra.mxu2 %v455_v54 }
  0x18   :  { %119 = vmatpush.bf16.msra.mxu0 %v327_v40  ;;  %294 = vmatpush.bf16.msra.mxu3 %v463_v55 }
  0x19   :  { %132 = vmatpush.bf16.msra.mxu1 %v331_v41 }
  0x1b   :  { %282 = vmatpush.bf16.msra.mxu2 %v454_v58 }
  0x1c   :  { %120 = vmatpush.bf16.msra.mxu0 %v319_v48  ;;  %295 = vmatpush.bf16.msra.mxu3 %v462_v59 }
  0x1d   :  { %133 = vmatpush.bf16.msra.mxu1 %v323_v49 }
  0x1f   :  { %283 = vmatpush.bf16.msra.mxu2 %v453_v61 }
  0x20   :  { %121 = vmatpush.bf16.msra.mxu0 %v311_v56  ;;  %296 = vmatpush.bf16.msra.mxu3 %v461_v62 }
  0x21   :  { %134 = vmatpush.bf16.msra.mxu1 %v315_v57 }
  0x23   :  { %122 = vmatmul.bf16.vlgmr.msra.gmra.mxu0 %v17_v60  ;;  %284 = vmatpush.bf16.msra.mxu2 %v452_v63 }
  0x24   :  { %135 = vmatmul.bf16.vlgmr.msra.gmra.mxu1 %v17_v60  ;;  %297 = vmatpush.bf16.msra.mxu3 %v460_v0 }
  0xa0   :  { %v123_v2 = vpop.f32.mrf.mxu0 }
  0xa1   :  { %v136_v3 = vpop.f32.mrf.mxu1 }
  0xa2   :  { %v141_v4 = vpack.c.bf16 %v136_v3, %v123_v2 }
  0xa4   :  { %v142_v6 = vunpack.c.l.bf16 %v141_v4  ;;  %v143_v7 = vunpack.c.h.bf16 %v141_v4 }
  0xa6   :  { %v145_v8 = vmul.f32 %v144_v5, %v142_v6  ;;  %v146_v9 = vmul.f32 %v144_v5, %v143_v7 }
  0xa8   :  { %v125_v10 = vpop.f32.mrf.mxu0  ;;  %v147_v11 = vpack.c.bf16 %v145_v8, %v145_v8  ;;  %v148_v12 = vpack.c.bf16 %v146_v9, %v146_v9 }
  0xa9   :  { %v138_v13 = vpop.f32.mrf.mxu1 }
  0xaa   :  { %285 = vmatmul.bf16.vlgmr.msra.gmra.mxu2 %v147_v11  ;;  %298 = vmatmul.bf16.vlgmr.msra.gmra.mxu3 %v148_v12 }
 0x12d   :  { %v286_v14 = vpop.f32.mrf.mxu2  ;;  %v299_v15 = vpop.f32.mrf.mxu3 }
 0x12e   :  { %v300_v16 = vadd.f32 %v299_v15, %v286_v14 }
 0x130   :  { %303 = vst [vmem:[%s650_s4] sm:$0xff] %v300_v16 }
 0x135   :  { %v288_v17 = vpop.f32.mrf.mxu2  ;;  %v301_v18 = vpop.f32.mrf.mxu3 }

</bundles_post_ra>
